<compile_context>
chip_gen: v5e
topology: v5e:2x2
jax: 0.10.0
libtpu: 0.0.40
codegen_flags: <defaults>
</compile_context>

<pallas_src>
import jax
import jax.numpy as jnp
from jax.experimental import pallas as pl
from jax.experimental.pallas import tpu as pltpu

EMBEDDING_SIZE = 50
HIDDEN_SIZE = 128
VOCABULARY_SIZE = 12000
STACK_SIZE = 2          # `stack` is concatenated after the embedding (size 2)
NUM_ACTIONS = 4         # constructor arg `num_actions` (small demo value)

K_PAD = 64              # 52 -> 64: contraction dim padded to a sublane multiple
TB_MAX = 512            # samples per grid step (cap; ~128 KiB obs block)


def _round_up(x, m):
    return ((x + m - 1) // m) * m


def _pick_tb(batch):
    """Tile of samples per grid step: multiple of 8, >=2 steps when batch>8."""
    if batch <= 8:
        return 8
    return min(TB_MAX, _round_up(pl.cdiv(batch, 2), 8))


def _policy_kernel(obs_ref,    # VMEM (TB, 64)   f32  [emb | stack | zero-pad]
                   w1_ref,     # VMEM (64, 128)  f32  (rows 52..63 are zeros)
                   b1_ref,     # VMEM (1, 128)
                   w2_ref,     # VMEM (128, A)
                   b2_ref,     # VMEM (1, A)
                   out_ref):   # VMEM (TB, A)
    # Layer 1: (TB,64)@(64,128) on the MXU + bias, ReLU on the VPU.
    h = jnp.dot(obs_ref[...], w1_ref[...], preferred_element_type=jnp.float32)
    h = jnp.maximum(h + b1_ref[...], 0.0)

    # Layer 2: (TB,128)@(128,A) + bias.
    logits = (jnp.dot(h, w2_ref[...], preferred_element_type=jnp.float32)
              + b2_ref[...])

    # Numerically stable softmax over the last (lane) axis; exact divide to
    # stay comfortably inside the 1e-5 tolerance.
    m = jnp.max(logits, axis=-1, keepdims=True)
    e = jnp.exp(logits - m)
    out_ref[...] = (e / jnp.sum(e, axis=-1, keepdims=True)).astype(out_ref.dtype)


def policy_forward_batch(words, stacks, emb_table, w1, b1, w2, b2, tb=None):
    """words: int32 (B,), stacks: f32 (B,2) -> f32 (B, num_actions)."""
    batch = words.shape[0]
    num_actions = w2.shape[1]
    in1 = EMBEDDING_SIZE + STACK_SIZE                     # 52

    if tb is None:
        tb = _pick_tb(batch)
    b_pad = _round_up(max(batch, tb), tb)
    num_steps = b_pad // tb

    # --- wrapper-side prep (cheap, one contiguous HBM slab for the kernel) ---
    # Embedding gather + concat with stacks, then pad K 52 -> 64 and the batch
    # up to a multiple of TB.  The zero K-padding is exact (0 * anything = 0).
    emb = jnp.take(emb_table, words, axis=0)              # (B, 50)
    obs = jnp.concatenate([emb, stacks.astype(jnp.float32)], axis=1)   # (B, 52)
    obs = jnp.pad(obs, ((0, b_pad - batch), (0, K_PAD - in1)))          # (Bp, 64)

    w1p = jnp.pad(w1, ((0, K_PAD - in1), (0, 0)))          # (64, 128)
    b1_2d = b1.reshape(1, HIDDEN_SIZE)
    b2_2d = b2.reshape(1, num_actions)

    grid_spec = pltpu.PrefetchScalarGridSpec(
        num_scalar_prefetch=0,
        grid=(num_steps,),
        in_specs=[
            # per-step block of TB samples
            pl.BlockSpec((tb, K_PAD), lambda i: (i, 0)),
            # weights/biases: constant block index -> DMA'd once, stay resident
            pl.BlockSpec((K_PAD, HIDDEN_SIZE),       lambda i: (0, 0)),
            pl.BlockSpec((1, HIDDEN_SIZE),           lambda i: (0, 0)),
            pl.BlockSpec((HIDDEN_SIZE, num_actions), lambda i: (0, 0)),
            pl.BlockSpec((1, num_actions),           lambda i: (0, 0)),
        ],
        out_specs=pl.BlockSpec((tb, num_actions), lambda i: (i, 0)),
    )

    out = pl.pallas_call(
        _policy_kernel,
        out_shape=jax.ShapeDtypeStruct((b_pad, num_actions), jnp.float32),
        grid_spec=grid_spec,
        compiler_params=pltpu.CompilerParams(
            dimension_semantics=("parallel",),   # independent sample tiles; 2 TCs on v7x
        ),
    )(obs, w1p, b1_2d, w2, b2_2d)

    return out[:batch]


def policy_forward(word, stack, emb_table, w1, b1, w2, b2):
    """Single-sample call matching torch Policy.forward: word (1,), stack (2,)."""
    out = policy_forward_batch(word.reshape(1), stack.reshape(1, STACK_SIZE),
                               emb_table, w1, b1, w2, b2)
    return out[0]                             # (num_actions,)


def policy_forward_ref(word, stack, emb_table, w1, b1, w2, b2):
    obs = jnp.concatenate([emb_table[word], stack])           # (52,)
    h = jnp.maximum(obs @ w1 + b1, 0.0)
    return jax.nn.softmax(h @ w2 + b2, axis=-1)


def init_params(key):
    k_emb, k_w1, k_b1, k_w2, k_b2 = jax.random.split(key, 5)
    in1 = EMBEDDING_SIZE + STACK_SIZE
    emb_table = jax.random.normal(k_emb, (VOCABULARY_SIZE, EMBEDDING_SIZE),
                                  jnp.float32)
    lim1 = 1.0 / jnp.sqrt(in1)
    w1 = jax.random.uniform(k_w1, (in1, HIDDEN_SIZE), jnp.float32, -lim1, lim1)
    b1 = jax.random.uniform(k_b1, (HIDDEN_SIZE,), jnp.float32, -lim1, lim1)
    lim2 = 1.0 / jnp.sqrt(HIDDEN_SIZE)
    w2 = jax.random.uniform(k_w2, (HIDDEN_SIZE, NUM_ACTIONS), jnp.float32,
                            -lim2, lim2)
    b2 = jax.random.uniform(k_b2, (NUM_ACTIONS,), jnp.float32, -lim2, lim2)
    return emb_table, w1, b1, w2, b2


if __name__ == "__main__":
    key = jax.random.PRNGKey(0)
    k_params, k_word, k_stack, k_word2, k_stack2 = jax.random.split(key, 5)

    emb_table, w1, b1, w2, b2 = init_params(k_params)

    # --- small batch (single grid step) ---
    BATCH = 8
    words = jax.random.randint(k_word, (BATCH,), 0, VOCABULARY_SIZE, jnp.int32)
    stacks = jax.random.normal(k_stack, (BATCH, STACK_SIZE), jnp.float32)

    out_b = policy_forward_batch(words, stacks, emb_table, w1, b1, w2, b2)
    out_b = jax.block_until_ready(out_b)

    ref_b = jax.vmap(
        lambda wd, st: policy_forward_ref(wd, st, emb_table, w1, b1, w2, b2)
    )(words, stacks)
    assert out_b.shape == (BATCH, NUM_ACTIONS)
    assert jnp.allclose(out_b, ref_b, atol=1e-5, rtol=1e-5)
    assert jnp.allclose(jnp.sum(out_b, axis=-1), 1.0, atol=1e-5)

    # --- larger batch (multi-step grid, non-multiple of the tile, padding path) ---
    BATCH2 = 1000
    words2 = jax.random.randint(k_word2, (BATCH2,), 0, VOCABULARY_SIZE, jnp.int32)
    stacks2 = jax.random.normal(k_stack2, (BATCH2, STACK_SIZE), jnp.float32)

    out_b2 = policy_forward_batch(words2, stacks2, emb_table, w1, b1, w2, b2)
    out_b2 = jax.block_until_ready(out_b2)

    ref_b2 = jax.vmap(
        lambda wd, st: policy_forward_ref(wd, st, emb_table, w1, b1, w2, b2)
    )(words2, stacks2)
    assert out_b2.shape == (BATCH2, NUM_ACTIONS)
    assert jnp.allclose(out_b2, ref_b2, atol=1e-5, rtol=1e-5)
    assert jnp.allclose(jnp.sum(out_b2, axis=-1), 1.0, atol=1e-5)

    # --- single-sample call (same semantics as the torch module's forward) ---
    out1 = policy_forward(words[:1], stacks[0], emb_table, w1, b1, w2, b2)
    out1 = jax.block_until_ready(out1)
    assert out1.shape == (NUM_ACTIONS,)
    assert jnp.allclose(out1, ref_b[0], atol=1e-5, rtol=1e-5)

    print("KERNEL_OK")
</pallas_src>

<mosaic_0001>
module attributes {stable_mosaic.version = 11 : i64} {
  func.func @_policy_kernel(%arg0: i32, %arg1: memref<8x64xf32, #tpu.memory_space<vmem>>, %arg2: memref<64x128xf32, #tpu.memory_space<vmem>>, %arg3: memref<1x128xf32, #tpu.memory_space<vmem>>, %arg4: memref<128x4xf32, #tpu.memory_space<vmem>>, %arg5: memref<1x4xf32, #tpu.memory_space<vmem>>, %arg6: memref<8x4xf32, #tpu.memory_space<vmem>>) attributes {dimension_semantics = [#tpu.dimension_semantics<parallel>], iteration_bounds = array<i64: 1>, scalar_prefetch = 0 : i64, scratch_operands = 0 : i64, tpu.core_type = #tpu.core_type<tc>, window_params = [{transform_indices = @transform_0, window_bounds = array<i64: 8, 64>}, {pipeline_mode = #tpu.pipeline_mode<synchronous>, transform_indices = @transform_1, window_bounds = array<i64: 64, 128>}, {pipeline_mode = #tpu.pipeline_mode<synchronous>, transform_indices = @transform_2, window_bounds = array<i64: 1, 128>}, {pipeline_mode = #tpu.pipeline_mode<synchronous>, transform_indices = @transform_3, window_bounds = array<i64: 128, 4>}, {pipeline_mode = #tpu.pipeline_mode<synchronous>, transform_indices = @transform_4, window_bounds = array<i64: 1, 4>}, {transform_indices = @transform_5, window_bounds = array<i64: 8, 4>}]} {
    %c0 = arith.constant 0 : index
    %c0_0 = arith.constant 0 : index
    %0 = vector.load %arg1[%c0, %c0_0] : memref<8x64xf32, #tpu.memory_space<vmem>>, vector<8x64xf32>
    %c0_1 = arith.constant 0 : index
    %c0_2 = arith.constant 0 : index
    %1 = vector.load %arg2[%c0_1, %c0_2] : memref<64x128xf32, #tpu.memory_space<vmem>>, vector<64x128xf32>
    %cst = arith.constant dense<0.000000e+00> : vector<8x128xf32>
    %2 = tpu.matmul %0, %1, %cst {dimension_numbers = #tpu.dot_dimension_numbers<[1], [0], [0], [1], [0, 0, 1, 1], [], []>} : vector<8x64xf32>, vector<64x128xf32>, vector<8x128xf32> -> vector<8x128xf32>
    %c0_3 = arith.constant 0 : index
    %c0_4 = arith.constant 0 : index
    %3 = vector.load %arg3[%c0_3, %c0_4] : memref<1x128xf32, #tpu.memory_space<vmem>>, vector<1x128xf32>
    %4 = vector.broadcast %3 : vector<1x128xf32> to vector<8x128xf32>
    %5 = arith.addf %2, %4 : vector<8x128xf32>
    %cst_5 = arith.constant 0.000000e+00 : f32
    %6 = vector.broadcast %cst_5 : f32 to vector<8x128xf32>
    %7 = arith.maximumf %5, %6 : vector<8x128xf32>
    %c0_6 = arith.constant 0 : index
    %c0_7 = arith.constant 0 : index
    %8 = vector.load %arg4[%c0_6, %c0_7] : memref<128x4xf32, #tpu.memory_space<vmem>>, vector<128x4xf32>
    %cst_8 = arith.constant dense<0.000000e+00> : vector<8x4xf32>
    %9 = tpu.matmul %7, %8, %cst_8 {dimension_numbers = #tpu.dot_dimension_numbers<[1], [0], [0], [1], [0, 0, 1, 1], [], []>} : vector<8x128xf32>, vector<128x4xf32>, vector<8x4xf32> -> vector<8x4xf32>
    %c0_9 = arith.constant 0 : index
    %c0_10 = arith.constant 0 : index
    %10 = vector.load %arg5[%c0_9, %c0_10] : memref<1x4xf32, #tpu.memory_space<vmem>>, vector<1x4xf32>
    %11 = vector.broadcast %10 : vector<1x4xf32> to vector<8x4xf32>
    %12 = arith.addf %9, %11 : vector<8x4xf32>
    %cst_11 = arith.constant dense<0xFF800000> : vector<8xf32>
    %13 = vector.multi_reduction <maximumf>, %12, %cst_11 [1] : vector<8x4xf32> to vector<8xf32>
    %14 = vector.shape_cast %13 : vector<8xf32> to vector<8x1xf32>
    %15 = vector.broadcast %14 : vector<8x1xf32> to vector<8x4xf32>
    %16 = arith.subf %12, %15 : vector<8x4xf32>
    %17 = math.exp %16 : vector<8x4xf32>
    %cst_12 = arith.constant dense<0.000000e+00> : vector<8xf32>
    %18 = vector.multi_reduction <add>, %17, %cst_12 [1] : vector<8x4xf32> to vector<8xf32>
    %19 = vector.shape_cast %18 : vector<8xf32> to vector<8x1xf32>
    %20 = vector.broadcast %19 : vector<8x1xf32> to vector<8x4xf32>
    %21 = arith.divf %17, %20 : vector<8x4xf32>
    %c0_13 = arith.constant 0 : index
    %c0_14 = arith.constant 0 : index
    %22 = vector.load %arg6[%c0_13, %c0_14] : memref<8x4xf32, #tpu.memory_space<vmem>>, vector<8x4xf32>
    tpu.vector_store %arg6[%c0_13, %c0_14], %21 {strides = array<i32>} : memref<8x4xf32, #tpu.memory_space<vmem>>, vector<8x4xf32>,
    return
  }
  func.func @transform_0(%arg0: i32) -> (i32, i32) {
    %c0_i32 = arith.constant 0 : i32
    %c0_i32_0 = arith.constant 0 : i32
    return %arg0, %c0_i32 : i32, i32
  }
  func.func @transform_1(%arg0: i32) -> (i32, i32) {
    %c0_i32 = arith.constant 0 : i32
    %c0_i32_0 = arith.constant 0 : i32
    %c0_i32_1 = arith.constant 0 : i32
    return %c0_i32, %c0_i32_0 : i32, i32
  }
  func.func @transform_2(%arg0: i32) -> (i32, i32) {
    %c0_i32 = arith.constant 0 : i32
    %c0_i32_0 = arith.constant 0 : i32
    %c0_i32_1 = arith.constant 0 : i32
    return %c0_i32, %c0_i32_0 : i32, i32
  }
  func.func @transform_3(%arg0: i32) -> (i32, i32) {
    %c0_i32 = arith.constant 0 : i32
    %c0_i32_0 = arith.constant 0 : i32
    %c0_i32_1 = arith.constant 0 : i32
    return %c0_i32, %c0_i32_0 : i32, i32
  }
  func.func @transform_4(%arg0: i32) -> (i32, i32) {
    %c0_i32 = arith.constant 0 : i32
    %c0_i32_0 = arith.constant 0 : i32
    %c0_i32_1 = arith.constant 0 : i32
    return %c0_i32, %c0_i32_0 : i32, i32
  }
  func.func @transform_5(%arg0: i32) -> (i32, i32) {
    %c0_i32 = arith.constant 0 : i32
    %c0_i32_0 = arith.constant 0 : i32
    return %arg0, %c0_i32 : i32, i32
  }
}

</mosaic_0001>

<bundles_post_ra>
// kernel: tpu_custom_call.1
= control target key start
LH: loop header
LB: loop body
LE: loop exit
PB: predicated region body
PF: predicated region fallthrough
CT: control target
= control target key end

     0   :  { %vm33_vm0 = vcmask 523264   ;;  %vm98_vm1 = vcmask 31744   ;;  %s252_s1 = inlined_call_operand.vmem [shape: f32[64,128], index: 1, kind: input, shape index: {}]   ;;  %s253_s3 = inlined_call_operand.vmem [shape: f32[128,4], index: 3, kind: input, shape index: {}]   ;;  %s254_s2 = inlined_call_operand.vmem [shape: f32[1,128], index: 2, kind: input, shape index: {}]   ;;  %s255_s0 = inlined_call_operand.vmem [shape: f32[8,64], index: 0, kind: input, shape index: {}]   ;;  %s256_s4 = inlined_call_operand.vmem [shape: f32[1,4], index: 4, kind: input, shape index: {}]   ;;  %s257_s5 = inlined_call_operand.vmem [shape: f32[8,4], index: 5, kind: output, shape index: {}]  }
   0x1   :  { %v28_v0 = vld [vmem:[%s252_s1 + $0x38] sm:$0xff]  ;;  %v27_v1 = vld [vmem:[%s252_s1 + $0x30] sm:$0xff]  ;;  %v26_v2 = vld [vmem:[%s252_s1 + $0x28] sm:$0xff] }
   0x2   :  { %45 = vmatpush.msra.mxu0 %v28_v0  ;;  %v73_v3 = vld [vmem:[%s253_s3 + $0x78] sm:$0xff]  ;;  %v72_v4 = vld [vmem:[%s253_s3 + $0x70] sm:$0xff]  ;;  %v25_v5 = vld [vmem:[%s252_s1 + $0x20] sm:$0xff] }
   0x3   :  { %78 = vmatpush.msra.mxu1 %v73_v3  ;;  %v71_v6 = vld [vmem:[%s253_s3 + $0x68] sm:$0xff]  ;;  %v24_v7 = vld [vmem:[%s252_s1 + $0x18] sm:$0xff]  ;;  %v70_v8 = vld [vmem:[%s253_s3 + $0x60] sm:$0xff] }
   0x4   :  { %46 = vmatpush.msra.mxu0 %v27_v1  ;;  %v23_v9 = vld [vmem:[%s252_s1 + $0x10] sm:$0xff]  ;;  %v69_v10 = vld [vmem:[%s253_s3 + $0x58] sm:$0xff]  ;;  %v22_v11 = vld [vmem:[%s252_s1 + $0x8] sm:$0xff] }
   0x5   :  { %79 = vmatpush.msra.mxu1 %v72_v4  ;;  %v68_v12 = vld [vmem:[%s253_s3 + $0x50] sm:$0xff]  ;;  %v21_v13 = vld [vmem:[%s252_s1] sm:$0xff]  ;;  %v67_v15 = vld [vmem:[%s253_s3 + $0x48] sm:$0xff] }
   0x6   :  { %47 = vmatpush.msra.mxu0 %v26_v2  ;;  %v20_v14 = vld [vmem:[%s255_s0] sm:$0xff]  ;;  %v65_v17 = vld [vmem:[%s253_s3 + $0x38] sm:$0xff]  ;;  %v64_v18 = vld [vmem:[%s253_s3 + $0x30] sm:$0xff] }
   0x7   :  { %80 = vmatpush.msra.mxu1 %v71_v6  ;;  %v66_v16 = vld [vmem:[%s253_s3 + $0x40] sm:$0xff]  ;;  %v63_v19 = vld [vmem:[%s253_s3 + $0x28] sm:$0xff]  ;;  %v61_v21 = vld [vmem:[%s253_s3 + $0x18] sm:$0xff] }
   0x8   :  { %48 = vmatpush.msra.mxu0 %v25_v5  ;;  %v62_v20 = vld [vmem:[%s253_s3 + $0x20] sm:$0xff]  ;;  %v60_v22 = vld [vmem:[%s253_s3 + $0x10] sm:$0xff]  ;;  %v59_v23 = vld [vmem:[%s253_s3 + $0x8] sm:$0xff] }
   0x9   :  { %81 = vmatpush.msra.mxu1 %v70_v8  ;;  %v58_v24 = vld [vmem:[%s253_s3] sm:$0xff] }
   0xa   :  { %49 = vmatpush.msra.mxu0 %v24_v7  ;;  %v129_v25 = vld [vmem:[%s254_s2] ss:$0 sm:$0xff] }
   0xb   :  { %82 = vmatpush.msra.mxu1 %v69_v10  ;;  %v130_v29 = vld [vmem:[%s256_s4] ss:$0 sm:$0xff] }
   0xc   :  { %50 = vmatpush.msra.mxu0 %v23_v9 }
   0xd   :  { %83 = vmatpush.msra.mxu1 %v68_v12 }
   0xe   :  { %51 = vmatpush.msra.mxu0 %v22_v11 }
   0xf   :  { %84 = vmatpush.msra.mxu1 %v67_v15 }
  0x10   :  { %52 = vmatpush.msra.mxu0 %v21_v13 }
  0x11   :  { %128 = vmatmul.msk.f32.vlgmr.msra.gmra.mxu0 %vm33_vm0, %v20_v14  ;;  %85 = vmatpush.msra.mxu1 %v66_v16 }
  0x13   :  { %86 = vmatpush.msra.mxu1 %v65_v17 }
  0x15   :  { %87 = vmatpush.msra.mxu1 %v64_v18 }
  0x17   :  { %88 = vmatpush.msra.mxu1 %v63_v19 }
  0x19   :  { %89 = vmatpush.msra.mxu1 %v62_v20 }
  0x1b   :  { %90 = vmatpush.msra.mxu1 %v61_v21 }
  0x1d   :  { %91 = vmatpush.msra.mxu1 %v60_v22 }
  0x1f   :  { %92 = vmatpush.msra.mxu1 %v59_v23 }
  0x21   :  { %93 = vmatpush.msra.mxu1 %v58_v24 }
  0x8e   :  { %v54_v26 = vpop.f32.mrf.mxu0 }
  0x8f   :  { %v55_v27 = vadd.f32 %v129_v25, %v54_v26 }
  0x91   :  { %v57_v28 = vmax.f32 %v55_v27, 0.0 }
  0x93   :  { %94 = vmatmul.f32.vlgmr.msra.gmra.mxu1 %v57_v28 }
 0x110   :  { %v95_v30 = vpop.f32.mrf.mxu1 }
 0x111   :  { %v96_v31 = vadd.f32 %v130_v29, %v95_v30 }
 0x113   :  { %v99_v32 = vsel %vm98_vm1, %v96_v31, -inf }
 0x114   :  { %100 = vmax.xlane.f32.xlu0 %v99_v32 }
 0x187   :  { %v101_v33 = vpop.xlane.xlu0 %100 }
 0x188   :  { %v102_v34 = vsub.f32 %v96_v31, %v101_v33 }
 0x18a   :  { %v103_v35 = vmul.f32 1.442695, %v102_v34 }
 0x18c   :  { %131 = vpow2.f32 %v103_v35 }
 0x192   :  { %v132_v36 = vpop.eup %131 }
 0x193   :  { %v105_v37 = vsel %vm98_vm1, %v132_v36, 0.0 }
 0x194   :  { %106 = vadd.xlane.f32.xlu0 %v105_v37 }
 0x207   :  { %v107_v38 = vpop.xlane.xlu0 %106 }
 0x208   :  { %133 = vrcp.f32 %v107_v38  ;;  %v119_v42 = vand.u32 2147483648, %v107_v38  ;;  %v117_v44 = vand.u32 2147483647, %v107_v38  ;;  %vm113_vm3 = vweird.f32 %v107_v38 }
 0x20a   :  { %v120_v46 = vor.u32 1.1754944e-38, %v119_v42  ;;  %vm118_vm5 = vcmp.eq.f32.partialorder %v117_v44, 8.507059e+37 }
 0x20e   :  { %v134_v39 = vpop.eup %133 }
 0x20f   :  { %v109_v40 = vmul.f32 %v134_v39, %v107_v38  ;;  %vm114_vm2 = vweird.f32 %v134_v39 }
 0x210   :  { %vm115_vm4 = vmor %vm113_vm3, %vm114_vm2 }
 0x211   :  { %v110_v41 = vsub.f32 1.0, %v109_v40 }
 0x213   :  { %v111_v43 = vmul.f32 %v134_v39, %v110_v41 }
 0x215   :  { %v112_v45 = vadd.f32 %v134_v39, %v111_v43 }
 0x217   :  { %v116_v47 = vsel %vm115_vm4, %v134_v39, %v112_v45 }
 0x218   :  { %v121_v48 = vsel %vm118_vm5, %v120_v46, %v116_v47 }
 0x219   :  { %v122_v49 = vmul.f32 %v132_v36, %v121_v48 }
 0x21b   :  { %123 = vst.msk [vmem:[%s257_s5] sm:$0xff] %vm98_vm1, %v122_v49 }

</bundles_post_ra>
